<compile_context>
chip_gen: v6e
topology: v6e:2x2x1
jax: 0.10.0
libtpu: 0.0.40
codegen_flags: <defaults>
</compile_context>

<pallas_src>
import functools

import jax
import jax.numpy as jnp
from jax.experimental import pallas as pl
from jax.experimental.pallas import tpu as pltpu

MARGIN = 0.5
EPS = 1e-8  # PyTorch F.cosine_similarity default eps


def _contrastive_cosine_kernel(e1_ref, e2_ref, lab_ref, out_ref, *,
                               true_b, block_b, margin):
    """One batch tile: (block_b, D) embeddings -> (block_b, 1) per-row loss terms."""
    e1 = e1_ref[...].astype(jnp.float32)          # (TB, D)
    e2 = e2_ref[...].astype(jnp.float32)          # (TB, D)
    lab = lab_ref[...].astype(jnp.float32)        # (TB, 1)

    # Row-wise reductions over the feature (lane) axis.
    dot = jnp.sum(e1 * e2, axis=-1, keepdims=True)    # (TB, 1)
    n1 = jnp.sum(e1 * e1, axis=-1, keepdims=True)     # (TB, 1)
    n2 = jnp.sum(e2 * e2, axis=-1, keepdims=True)     # (TB, 1)

    # rsqrt goes to the EUP (its own VLIW slot); avoids the f32 divide chain.
    inv_norm = jax.lax.rsqrt(jnp.maximum(n1 * n2, EPS * EPS))
    cd = 1.0 - dot * inv_norm                          # cosine distance

    hinge = jnp.maximum(cd - margin, 0.0)
    terms = (1.0 - lab) * (cd * cd) + lab * (hinge * hinge)   # (TB, 1)

    # Mask rows that are padding (batch padded up to a multiple of block_b).
    row = pl.program_id(0) * block_b + jax.lax.broadcasted_iota(
        jnp.int32, terms.shape, 0)
    terms = jnp.where(row < true_b, terms, 0.0)

    out_ref[...] = terms


def _pick_block_rows(batch, feat, itemsize):
    """Pick a batch tile: ~2 MiB per input block, sublane-aligned, <= padded batch."""
    align = 8 if itemsize >= 4 else (16 if itemsize == 2 else 32)
    target_bytes = 2 << 20                      # safe under v5e 16 MiB scoped VMEM
    rows = target_bytes // max(1, feat * itemsize)
    rows = max(align, min(4096, rows))
    rows = (rows // align) * align
    padded_batch = ((batch + align - 1) // align) * align
    rows = min(rows, padded_batch)
    return max(align, (rows // align) * align)


def contrastive_loss_cosine(embedding1, embedding2, label, margin=MARGIN):
    """embedding1, embedding2: (B, D); label: (B,) -> scalar f32 loss."""
    B, D = embedding1.shape
    label2d = label.reshape(B, 1).astype(jnp.float32)

    tb = _pick_block_rows(B, D, embedding1.dtype.itemsize)
    num_blocks = -(-B // tb)
    b_pad = num_blocks * tb

    if b_pad != B:
        pad = b_pad - B
        embedding1 = jnp.pad(embedding1, ((0, pad), (0, 0)))
        embedding2 = jnp.pad(embedding2, ((0, pad), (0, 0)))
        label2d = jnp.pad(label2d, ((0, pad), (0, 0)))

    kernel = functools.partial(
        _contrastive_cosine_kernel, true_b=B, block_b=tb, margin=float(margin))

    # NOTE: for very small D (e.g. 32) lane occupancy is 25%; packing 4 rows per
    # 128-lane vreg would help at large B, but is skipped here for clarity.
    terms = pl.pallas_call(
        kernel,
        out_shape=jax.ShapeDtypeStruct((b_pad, 1), jnp.float32),
        grid_spec=pltpu.PrefetchScalarGridSpec(
            num_scalar_prefetch=0,
            grid=(num_blocks,),
            in_specs=[
                pl.BlockSpec((tb, D), lambda i: (i, 0)),
                pl.BlockSpec((tb, D), lambda i: (i, 0)),
                pl.BlockSpec((tb, 1), lambda i: (i, 0)),
            ],
            out_specs=pl.BlockSpec((tb, 1), lambda i: (i, 0)),
        ),
        compiler_params=pltpu.CompilerParams(
            dimension_semantics=("parallel",),   # independent blocks -> v7x 2-TC split
        ),
    )(embedding1, embedding2, label2d)

    # Padded rows were zeroed in-kernel; divide by the true batch size.
    return jnp.sum(terms) / jnp.float32(B)


def _reference(e1, e2, label):
    e1 = e1.astype(jnp.float32)
    e2 = e2.astype(jnp.float32)
    label = label.astype(jnp.float32)
    dot = jnp.sum(e1 * e2, axis=-1)
    n1 = jnp.sum(e1 * e1, axis=-1)
    n2 = jnp.sum(e2 * e2, axis=-1)
    cos = dot / jnp.sqrt(jnp.maximum(n1 * n2, EPS * EPS))
    cd = 1.0 - cos
    hinge = jnp.maximum(cd - MARGIN, 0.0)
    return jnp.mean((1.0 - label) * cd**2 + label * hinge**2)


if __name__ == "__main__":
    key = jax.random.PRNGKey(0)
    k1, k2, k3 = jax.random.split(key, 3)

    B, D = 8, 32  # small shapes: batch of embedding pairs with hidden=32
    embedding1 = jax.random.normal(k1, (B, D), dtype=jnp.float32)
    embedding2 = jax.random.normal(k2, (B, D), dtype=jnp.float32)
    label = jax.random.bernoulli(k3, 0.5, (B,)).astype(jnp.float32)

    loss = contrastive_loss_cosine(embedding1, embedding2, label)
    jax.block_until_ready(loss)

    ref = _reference(embedding1, embedding2, label)
    assert jnp.allclose(loss, ref, atol=1e-5, rtol=1e-5), (loss, ref)

    print("KERNEL_OK")
</pallas_src>

<mosaic_0001>
module attributes {stable_mosaic.version = 11 : i64} {
  func.func @_contrastive_cosine_kernel(%arg0: i32, %arg1: memref<8x32xf32, #tpu.memory_space<vmem>>, %arg2: memref<8x32xf32, #tpu.memory_space<vmem>>, %arg3: memref<8x1xf32, #tpu.memory_space<vmem>>, %arg4: memref<8x1xf32, #tpu.memory_space<vmem>>) attributes {dimension_semantics = [#tpu.dimension_semantics<parallel>], iteration_bounds = array<i64: 1>, scalar_prefetch = 0 : i64, scratch_operands = 0 : i64, tpu.core_type = #tpu.core_type<tc>, window_params = [{transform_indices = @transform_0, window_bounds = array<i64: 8, 32>}, {transform_indices = @transform_1, window_bounds = array<i64: 8, 32>}, {transform_indices = @transform_2, window_bounds = array<i64: 8, 1>}, {transform_indices = @transform_3, window_bounds = array<i64: 8, 1>}]} {
    %c0 = arith.constant 0 : index
    %c0_0 = arith.constant 0 : index
    %0 = vector.load %arg1[%c0, %c0_0] : memref<8x32xf32, #tpu.memory_space<vmem>>, vector<8x32xf32>
    %c0_1 = arith.constant 0 : index
    %c0_2 = arith.constant 0 : index
    %1 = vector.load %arg2[%c0_1, %c0_2] : memref<8x32xf32, #tpu.memory_space<vmem>>, vector<8x32xf32>
    %c0_3 = arith.constant 0 : index
    %c0_4 = arith.constant 0 : index
    %2 = vector.load %arg3[%c0_3, %c0_4] : memref<8x1xf32, #tpu.memory_space<vmem>>, vector<8x1xf32>
    %3 = arith.mulf %0, %1 : vector<8x32xf32>
    %cst = arith.constant dense<0.000000e+00> : vector<8xf32>
    %4 = vector.multi_reduction <add>, %3, %cst [1] : vector<8x32xf32> to vector<8xf32>
    %5 = vector.shape_cast %4 : vector<8xf32> to vector<8x1xf32>
    %6 = arith.mulf %0, %0 : vector<8x32xf32>
    %cst_5 = arith.constant dense<0.000000e+00> : vector<8xf32>
    %7 = vector.multi_reduction <add>, %6, %cst_5 [1] : vector<8x32xf32> to vector<8xf32>
    %8 = vector.shape_cast %7 : vector<8xf32> to vector<8x1xf32>
    %9 = arith.mulf %1, %1 : vector<8x32xf32>
    %cst_6 = arith.constant dense<0.000000e+00> : vector<8xf32>
    %10 = vector.multi_reduction <add>, %9, %cst_6 [1] : vector<8x32xf32> to vector<8xf32>
    %11 = vector.shape_cast %10 : vector<8xf32> to vector<8x1xf32>
    %12 = arith.mulf %8, %11 : vector<8x1xf32>
    %cst_7 = arith.constant 1.000000e-16 : f32
    %13 = vector.broadcast %cst_7 : f32 to vector<8x1xf32>
    %14 = arith.maximumf %12, %13 : vector<8x1xf32>
    %15 = math.rsqrt %14 : vector<8x1xf32>
    %16 = arith.mulf %5, %15 : vector<8x1xf32>
    %cst_8 = arith.constant 1.000000e+00 : f32
    %17 = vector.broadcast %cst_8 : f32 to vector<8x1xf32>
    %18 = arith.subf %17, %16 : vector<8x1xf32>
    %cst_9 = arith.constant 5.000000e-01 : f32
    %19 = vector.broadcast %cst_9 : f32 to vector<8x1xf32>
    %20 = arith.subf %18, %19 : vector<8x1xf32>
    %cst_10 = arith.constant 0.000000e+00 : f32
    %21 = vector.broadcast %cst_10 : f32 to vector<8x1xf32>
    %22 = arith.maximumf %20, %21 : vector<8x1xf32>
    %cst_11 = arith.constant 1.000000e+00 : f32
    %23 = vector.broadcast %cst_11 : f32 to vector<8x1xf32>
    %24 = arith.subf %23, %2 : vector<8x1xf32>
    %25 = arith.mulf %18, %18 : vector<8x1xf32>
    %26 = arith.mulf %24, %25 : vector<8x1xf32>
    %27 = arith.mulf %22, %22 : vector<8x1xf32>
    %28 = arith.mulf %2, %27 : vector<8x1xf32>
    %29 = arith.addf %26, %28 : vector<8x1xf32>
    %c8_i32 = arith.constant 8 : i32
    %30 = arith.muli %arg0, %c8_i32 : i32
    %31 = tpu.iota {dimensions = array<i32: 0>} : vector<8x1xi32>
    %32 = vector.broadcast %30 : i32 to vector<8x1xi32>
    %33 = arith.addi %32, %31 : vector<8x1xi32>
    %c8_i32_12 = arith.constant 8 : i32
    %34 = vector.broadcast %c8_i32_12 : i32 to vector<8x1xi32>
    %35 = arith.cmpi slt, %33, %34 : vector<8x1xi32>
    %cst_13 = arith.constant 0.000000e+00 : f32
    %36 = vector.broadcast %cst_13 : f32 to vector<8x1xf32>
    %37 = arith.select %35, %29, %36 : vector<8x1xi1>, vector<8x1xf32>
    %c0_14 = arith.constant 0 : index
    %c0_15 = arith.constant 0 : index
    %38 = vector.load %arg4[%c0_14, %c0_15] : memref<8x1xf32, #tpu.memory_space<vmem>>, vector<8x1xf32>
    tpu.vector_store %arg4[%c0_14, %c0_15], %37 {strides = array<i32>} : memref<8x1xf32, #tpu.memory_space<vmem>>, vector<8x1xf32>,
    return
  }
  func.func @transform_0(%arg0: i32) -> (i32, i32) {
    %c0_i32 = arith.constant 0 : i32
    %c0_i32_0 = arith.constant 0 : i32
    return %arg0, %c0_i32 : i32, i32
  }
  func.func @transform_1(%arg0: i32) -> (i32, i32) {
    %c0_i32 = arith.constant 0 : i32
    %c0_i32_0 = arith.constant 0 : i32
    return %arg0, %c0_i32 : i32, i32
  }
  func.func @transform_2(%arg0: i32) -> (i32, i32) {
    %c0_i32 = arith.constant 0 : i32
    %c0_i32_0 = arith.constant 0 : i32
    return %arg0, %c0_i32 : i32, i32
  }
  func.func @transform_3(%arg0: i32) -> (i32, i32) {
    %c0_i32 = arith.constant 0 : i32
    %c0_i32_0 = arith.constant 0 : i32
    return %arg0, %c0_i32 : i32, i32
  }
}

</mosaic_0001>

<bundles_post_ra>
// kernel: tpu_custom_call.1
= control target key start
LH: loop header
LB: loop body
LE: loop exit
PB: predicated region body
PF: predicated region fallthrough
CT: control target
= control target key end

     0   :  { %8 = vsyncpa [#allocation3], 0  ;;  %s95_s12 = smov [#allocation2]   ;;  %s128_s0 = inlined_call_operand.vmem [shape: f32[8,32], index: 0, kind: input, shape index: {}]   ;;  %s129_s1 = inlined_call_operand.hbm [shape: f32[8,32], index: 1, kind: input, shape index: {}]   ;;  %s130_s2 = inlined_call_operand.vmem [shape: f32[8,1], index: 2, kind: input, shape index: {}]   ;;  %s131_s3 = inlined_call_operand.vmem [shape: f32[8,1], index: 3, kind: output, shape index: {}]  }
   0x1   :  { %s17_s13 = sshll.u32 %s95_s12, 4  ;;  %s18_s13 = int_to_ptr.vmem [resolvable:$true] %s17_s13 }
   0x2   :  { %s81_s14 = scalar_lea.vmem %s18_s13, 128  ;;  %p86_p1 = scmp.lt.s32.totalorder %s18_s13, %s18_s13 }
   0x3   :  { %p82_p0 = scmp.ne.s32.totalorder %s18_s13, %s81_s14  ;;  %p87_p2 = scmp.lt.s32.totalorder %s81_s14, %s81_s14 }
   0x5   :  { %p88_p3 = por %p87_p2, %p86_p1 }
   0x7   :  { %p89_p4 = pnand %p88_p3, %p82_p0 }
   0x9   :  { %92 = shalt.err (!%p89_p4)
}
   0xa   :  { %20 = dma.hbm_to_vmem [thread:$0]  %s129_s1, 128, %s18_s13, [#allocation3]  }
   0xb   :  { %93 = dma.done.wait [#allocation3], 128  }
   0xc   :  { %94 = vsyncadd [#allocation3], 4294967168  ;;  %v26_v0 = vld [vmem:[%s128_s0] sm:$0xff]  ;;  %vm30_vm0 = vcmask 261120   ;;  %vm62_vm1 = vcmask 7168  }
   0xd   :  { %v27_v1 = vld [vmem:[#allocation2] sm:$0xff]  ;;  %v34_v2 = vmul.f32 %v26_v0, %v26_v0 }
   0xe   :  { %v38_v3 = vmul.f32 %v27_v1, %v27_v1  ;;  %v29_v4 = vmul.f32 %v27_v1, %v26_v0  ;;  %v28_v16 = vld [vmem:[%s130_s2] sm:$0xff] }
   0xf   :  { %v35_v5 = vsel %vm30_vm0, %v34_v2, 0.0  ;;  %v49_v18 = vsub.f32 1.0, %v28_v16 }
  0x10   :  { %v31_v6 = vsel %vm30_vm0, %v29_v4, 0.0  ;;  %36 = vadd.xlane.f32.xlu0 %v35_v5  ;;  %v39_v7 = vsel %vm30_vm0, %v38_v3, 0.0 }
  0x11   :  { %32 = vadd.xlane.f32.xlu1 %v31_v6 }
  0x14   :  { %40 = vadd.xlane.f32.xlu0 %v39_v7 }
  0x99   :  { %v37_v8 = vpop.xlane.xlu0 %36 }
  0x9a   :  { %v33_v12 = vpop.xlane.xlu1 %32 }
  0x9d   :  { %v41_v9 = vpop.xlane.xlu0 %40 }
  0x9e   :  { %v42_v10 = vmul.f32 %v41_v9, %v37_v8 }
  0xa0   :  { %v43_v11 = vmax.f32 %v42_v10, 1e-16 }
  0xa2   :  { %71 = vrsqrt.f32 %v43_v11 }
  0xaf   :  { %v72_v13 = vpop.eup %71 }
  0xb0   :  { %v45_v14 = vmul.f32 %v72_v13, %v33_v12 }
  0xb2   :  { %v46_v15 = vsub.f32 1.0, %v45_v14 }
  0xb4   :  { %v69_v17 = vadd.f32 -0.5, %v46_v15  ;;  %v50_v20 = vmul.f32 %v46_v15, %v46_v15 }
  0xb6   :  { %v48_v19 = vmax.f32 %v69_v17, 0.0  ;;  %v51_v22 = vmul.f32 %v50_v20, %v49_v18 }
  0xb8   :  { %v52_v21 = vmul.f32 %v48_v19, %v48_v19 }
  0xba   :  { %v53_v23 = vmul.f32 %v52_v21, %v28_v16 }
  0xbc   :  { %v54_v24 = vadd.f32 %v53_v23, %v51_v22 }
  0xbe   :  { %63 = vst.msk [vmem:[%s131_s3] sm:$0xff] %vm62_vm1, %v54_v24 }
  0xbf   :  { %68 = vsyncpa [#allocation3], 1 }

</bundles_post_ra>
